<compile_context>
chip_gen: v5e
topology: v5e:2x2
jax: 0.10.0
libtpu: 0.0.40
codegen_flags: <defaults>
</compile_context>

<pallas_src>
import jax
import jax.numpy as jnp
import numpy as np
from jax.experimental import pallas as pl
from jax.experimental.pallas import tpu as pltpu


# ---------------------------------------------------------------------------
# Kernels (shared by both weight layouts; only the shapes differ).
# ---------------------------------------------------------------------------
def _stats_kernel(x_ref, w_ref, alpha_ref, stat_ref):
    """deconv (bf16 matmul, f32 acc) + PReLU + per-block partial BN sums."""
    y = jnp.dot(x_ref[...], w_ref[...], preferred_element_type=jnp.float32)
    a = alpha_ref[0]                                   # PReLU slope (SMEM scalar)
    y = jnp.where(y >= 0, y, a * y)                    # PReLU in f32
    s1 = jnp.sum(y, axis=0, keepdims=True)             # (1, Cout)
    s2 = jnp.sum(y * y, axis=0, keepdims=True)         # (1, Cout)
    stat_ref[0, :, :] = jnp.concatenate([s1, s2], axis=0)   # single store


def _apply_kernel(x_ref, w_ref, alpha_ref, scale_ref, shift_ref, o_ref):
    """Recompute deconv + PReLU and apply the BatchNorm affine (lane-dense)."""
    y = jnp.dot(x_ref[...], w_ref[...], preferred_element_type=jnp.float32)
    a = alpha_ref[0]
    y = jnp.where(y >= 0, y, a * y)
    o_ref[...] = y * scale_ref[...] + shift_ref[...]


# ---------------------------------------------------------------------------
# Sizing helpers
# ---------------------------------------------------------------------------
def _round_up(x, m):
    return ((x + m - 1) // m) * m


def _vmem_limit_bytes():
    """Per-generation VMEM budget (v5e/v6e: 128 MiB physical, v7x: 64 MiB)."""
    phys = 64 << 20                      # conservative fallback (v7x per-core)
    try:
        phys = int(getattr(pltpu.get_tpu_info(), "vmem_capacity_bytes", phys))
    except Exception:
        pass
    return max(32 << 20, min(phys * 3 // 4, 96 << 20))


def _pick_row_tile(n_rows, k, cout, vmem_limit, target_steps=16):
    """Rows per grid step: fit VMEM (minus the resident weight), keep several
    grid steps (pipelining / both v7x cores), bound the zero-row padding."""
    w_bytes = 2 * (k * cout * 2)                # resident bf16 weight, x2 buffers
    per_row = 4 * k + 12 * cout                 # bf16 in x2 + f32 out x2 + f32 y
    avail = max(vmem_limit - w_bytes - (4 << 20), per_row * 16)
    tr_fit = max(16, (avail // per_row) // 16 * 16)
    tr_work = _round_up(max(1, -(-n_rows // target_steps)), 16)   # bounded padding
    return max(16, min(tr_fit, tr_work, 2048))


# ---------------------------------------------------------------------------
# Two-pass runner (layout-agnostic): x_rows (R, K) bf16  @  wmat (K, Cout) bf16
# Cout = groups * C, columns ordered as `groups` repeats of the C channels.
# ---------------------------------------------------------------------------
def _run_two_pass(x_rows, wmat, alpha, gamma, beta, eps, groups, count):
    R, K = x_rows.shape
    Cout = wmat.shape[1]
    C = Cout // groups

    vmem_limit = _vmem_limit_bytes()
    TR = _pick_row_tile(R, K, Cout, vmem_limit)
    R_pad = _round_up(R, TR)
    if R_pad != R:           # zero rows: PReLU(0) = 0 -> no BN-sum contribution
        x_rows = jnp.pad(x_rows, ((0, R_pad - R), (0, 0)))
    grid = R_pad // TR

    alpha_arr = jnp.asarray(alpha, jnp.float32).reshape(1)
    cparams = pltpu.CompilerParams(
        dimension_semantics=("parallel",),
        vmem_limit_bytes=vmem_limit)

    # ---- pass 1: partial BN statistics only ---------------------------------
    stats = pl.pallas_call(
        _stats_kernel,
        out_shape=jax.ShapeDtypeStruct((grid, 2, Cout), jnp.float32),
        grid_spec=pltpu.PrefetchScalarGridSpec(
            num_scalar_prefetch=0,
            grid=(grid,),
            in_specs=[
                pl.BlockSpec((TR, K), lambda i: (i, 0)),
                pl.BlockSpec((K, Cout), lambda i: (0, 0)),
                pl.BlockSpec(memory_space=pltpu.MemorySpace.SMEM),
            ],
            out_specs=pl.BlockSpec((1, 2, Cout), lambda i: (i, 0, 0))),
        compiler_params=cparams,
    )(x_rows, wmat, alpha_arr)

    # ---- BN stats -> per-channel scale / shift (tiny, in XLA) ---------------
    tot = jnp.sum(stats, axis=0).reshape(2, groups, C).sum(axis=1)    # (2, C)
    mean = tot[0] / count
    var = jnp.maximum(tot[1] / count - mean * mean, 0.0)
    rstd = 1.0 / jnp.sqrt(var + eps)
    scale = gamma.astype(jnp.float32) * rstd
    shift = beta.astype(jnp.float32) - mean * scale
    # TODO(synk): running_mean / running_var buffer updates (stateful side
    # effects of nn.BatchNorm2d in training mode) are not materialized here.
    scale_w = jnp.tile(scale, groups).reshape(1, Cout)
    shift_w = jnp.tile(shift, groups).reshape(1, Cout)

    # ---- pass 2: recompute + BN affine, write final output once -------------
    out = pl.pallas_call(
        _apply_kernel,
        out_shape=jax.ShapeDtypeStruct((R_pad, Cout), jnp.float32),
        grid_spec=pltpu.PrefetchScalarGridSpec(
            num_scalar_prefetch=0,
            grid=(grid,),
            in_specs=[
                pl.BlockSpec((TR, K), lambda i: (i, 0)),
                pl.BlockSpec((K, Cout), lambda i: (0, 0)),
                pl.BlockSpec(memory_space=pltpu.MemorySpace.SMEM),
                pl.BlockSpec((1, Cout), lambda i: (0, 0)),
                pl.BlockSpec((1, Cout), lambda i: (0, 0)),
            ],
            out_specs=pl.BlockSpec((TR, Cout), lambda i: (i, 0))),
        compiler_params=cparams,
    )(x_rows, wmat, alpha_arr, scale_w, shift_w)

    return out[:R]


# Gate from the performance review: block-diagonal weight only while W*C is
# small enough that the K-padding helps and the weight stays tiny in VMEM.
_BLOCKDIAG_MAX_WC = 512


def deconvolution_forward(x_nchw, weight, prelu_alpha, gamma, beta, eps=1e-5):
    N, C, H, W = x_nchw.shape
    x_nhwc = jnp.transpose(x_nchw, (0, 2, 3, 1))
    wt = jnp.transpose(weight, (0, 2, 3, 1)).astype(jnp.float32)   # (ci, a, b, co)
    count = jnp.float32(N * H * W * 4)                             # N * 2H * 2W

    if W * C <= _BLOCKDIAG_MAX_WC:
        # --- path A: one matmul row per input image-row ----------------------
        # Block-diagonal weight, columns already in NHWC (a, w, b, c) order, so
        # the kernel writes interleaved output double-rows directly.
        WC, C4 = W * C, 4 * W * C
        x_rows = x_nhwc.reshape(N * H, WC).astype(jnp.bfloat16)
        # Diagonal embedding via scatter (no dense eye-einsum / W^2*4C^2 MACs).
        # TODO(synk): depends only on `weight`; hoist/cache outside the forward.
        wbig = jnp.zeros((W, C, 2, W, 2, C), jnp.float32)
        wbig = wbig.at[jnp.arange(W), :, :, jnp.arange(W), :, :].set(
            jnp.broadcast_to(wt, (W, C, 2, 2, C)))
        wbig = wbig.reshape(WC, C4).astype(jnp.bfloat16)

        out = _run_two_pass(x_rows, wbig, prelu_alpha, gamma, beta, eps,
                            groups=4 * W, count=count)
        out = out.reshape(N, 2 * H, 2 * W, C)          # rows are already NHWC
    else:
        # --- path B: per-pixel (C, 4C) matmul (K = C already MXU-sized) ------
        x_pix = x_nhwc.reshape(N * H * W, C).astype(jnp.bfloat16)
        wmat = wt.reshape(C, 4 * C).astype(jnp.bfloat16)
        out = _run_two_pass(x_pix, wmat, prelu_alpha, gamma, beta, eps,
                            groups=4, count=count)
        out = out.reshape(N, H, W, 2, 2, C)
        out = jnp.transpose(out, (0, 1, 3, 2, 4, 5)).reshape(N, 2 * H, 2 * W, C)

    # TODO(synk): return NHWC directly when the consumer allows it; with small C
    # the NCHW layout is lane-sparse, so the layout change is left to XLA here.
    return jnp.transpose(out, (0, 3, 1, 2))


# ---------------------------------------------------------------------------
# Pure-JAX reference mirroring the PyTorch forward (training-mode BatchNorm).
# ---------------------------------------------------------------------------
def _reference(x, weight, alpha, gamma, beta, eps=1e-5):
    N, C, H, W = x.shape
    y = jnp.einsum('nihw,ioab->nohawb', x, weight)           # (N, C, H, 2, W, 2)
    y = y.reshape(N, C, 2 * H, 2 * W)
    y = jnp.where(y >= 0, y, alpha * y)                      # PReLU
    mean = y.mean(axis=(0, 2, 3), keepdims=True)
    var = ((y - mean) ** 2).mean(axis=(0, 2, 3), keepdims=True)
    y = (y - mean) / jnp.sqrt(var + eps)
    return y * gamma.reshape(1, C, 1, 1) + beta.reshape(1, C, 1, 1)


if __name__ == "__main__":
    key = jax.random.PRNGKey(0)
    kx, kw = jax.random.split(key)

    N, C, H, W = 2, 4, 16, 16
    x = jax.random.normal(kx, (N, C, H, W), jnp.float32)
    # Deterministic synthetic parameters (shapes from the module __init__).
    weight = jax.random.normal(kw, (C, C, 2, 2), jnp.float32) * 0.5  # ConvTranspose2d
    prelu_alpha = jnp.float32(0.25)                                  # PReLU default
    gamma = jnp.ones((C,), jnp.float32)                              # BN weight
    beta = jnp.zeros((C,), jnp.float32)                              # BN bias

    fwd = jax.jit(deconvolution_forward)
    out = jax.block_until_ready(fwd(x, weight, prelu_alpha, gamma, beta))
    assert out.shape == (N, C, 2 * H, 2 * W)

    # The kernel feeds the MXU in bfloat16 (per the perf review); compare
    # against the f32 reference evaluated on the same bf16-rounded inputs so
    # the check isolates kernel structure / accumulation / BN correctness.
    x_r = x.astype(jnp.bfloat16).astype(jnp.float32)
    w_r = weight.astype(jnp.bfloat16).astype(jnp.float32)
    ref = _reference(x_r, w_r, jnp.float32(0.25), gamma, beta)
    np.testing.assert_allclose(np.asarray(out), np.asarray(ref),
                               rtol=1e-2, atol=1e-2)

    print("KERNEL_OK")
</pallas_src>

<mosaic_0001>
module attributes {stable_mosaic.version = 11 : i64} {
  func.func @_stats_kernel(%arg0: i32, %arg1: memref<16x64xbf16, #tpu.memory_space<vmem>>, %arg2: memref<64x256xbf16, #tpu.memory_space<vmem>>, %arg3: memref<1xf32, #tpu.memory_space<smem>>, %arg4: memref<1x2x256xf32, #tpu.memory_space<vmem>>) attributes {dimension_semantics = [#tpu.dimension_semantics<parallel>], iteration_bounds = array<i64: 2>, scalar_prefetch = 0 : i64, scratch_operands = 0 : i64, tpu.core_type = #tpu.core_type<tc>, window_params = [{transform_indices = @transform_0, window_bounds = array<i64: 16, 64>}, {pipeline_mode = #tpu.pipeline_mode<synchronous>, transform_indices = @transform_1, window_bounds = array<i64: 64, 256>}, {transform_indices = @transform_2, window_bounds = array<i64: 1>}, {transform_indices = @transform_3, window_bounds = array<i64: 1, 2, 256>}]} {
    %c0 = arith.constant 0 : index
    %c0_0 = arith.constant 0 : index
    %0 = vector.load %arg1[%c0, %c0_0] : memref<16x64xbf16, #tpu.memory_space<vmem>>, vector<16x64xbf16>
    %c0_1 = arith.constant 0 : index
    %c0_2 = arith.constant 0 : index
    %1 = vector.load %arg2[%c0_1, %c0_2] : memref<64x256xbf16, #tpu.memory_space<vmem>>, vector<64x256xbf16>
    %cst = arith.constant dense<0.000000e+00> : vector<16x256xf32>
    %2 = tpu.matmul %0, %1, %cst {dimension_numbers = #tpu.dot_dimension_numbers<[1], [0], [0], [1], [0, 0, 1, 1], [], []>} : vector<16x64xbf16>, vector<64x256xbf16>, vector<16x256xf32> -> vector<16x256xf32>
    %c0_3 = arith.constant 0 : index
    %3 = memref.load %arg3[%c0_3] : memref<1xf32, #tpu.memory_space<smem>>
    %cst_4 = arith.constant 0.000000e+00 : f32
    %4 = vector.broadcast %cst_4 : f32 to vector<16x256xf32>
    %5 = arith.cmpf oge, %2, %4 : vector<16x256xf32>
    %6 = vector.broadcast %3 : f32 to vector<16x256xf32>
    %7 = arith.mulf %6, %2 : vector<16x256xf32>
    %8 = arith.select %5, %2, %7 : vector<16x256xi1>, vector<16x256xf32>
    %cst_5 = arith.constant dense<0.000000e+00> : vector<256xf32>
    %9 = vector.multi_reduction <add>, %8, %cst_5 [0] : vector<16x256xf32> to vector<256xf32>
    %10 = vector.shape_cast %9 : vector<256xf32> to vector<1x256xf32>
    %11 = arith.mulf %8, %8 : vector<16x256xf32>
    %cst_6 = arith.constant dense<0.000000e+00> : vector<256xf32>
    %12 = vector.multi_reduction <add>, %11, %cst_6 [0] : vector<16x256xf32> to vector<256xf32>
    %13 = vector.shape_cast %12 : vector<256xf32> to vector<1x256xf32>
    %14 = tpu.concatenate %10, %13 in 0 : vector<1x256xf32>, vector<1x256xf32> -> vector<2x256xf32>
    %c0_7 = arith.constant 0 : index
    %c0_8 = arith.constant 0 : index
    %c0_9 = arith.constant 0 : index
    %15 = vector.load %arg4[%c0_7, %c0_8, %c0_9] : memref<1x2x256xf32, #tpu.memory_space<vmem>>, vector<1x2x256xf32>
    %16 = vector.shape_cast %15 : vector<1x2x256xf32> to vector<2x256xf32>
    %17 = vector.shape_cast %14 : vector<2x256xf32> to vector<1x2x256xf32>
    tpu.vector_store %arg4[%c0_7, %c0_8, %c0_9], %17 {strides = array<i32>} : memref<1x2x256xf32, #tpu.memory_space<vmem>>, vector<1x2x256xf32>,
    return
  }
  func.func @transform_0(%arg0: i32) -> (i32, i32) {
    %c0_i32 = arith.constant 0 : i32
    %c0_i32_0 = arith.constant 0 : i32
    return %arg0, %c0_i32 : i32, i32
  }
  func.func @transform_1(%arg0: i32) -> (i32, i32) {
    %c0_i32 = arith.constant 0 : i32
    %c0_i32_0 = arith.constant 0 : i32
    %c0_i32_1 = arith.constant 0 : i32
    return %c0_i32, %c0_i32_0 : i32, i32
  }
  func.func @transform_2(%arg0: i32) -> i32 {
    %c0_i32 = arith.constant 0 : i32
    %c0_i32_0 = arith.constant 0 : i32
    return %c0_i32 : i32
  }
  func.func @transform_3(%arg0: i32) -> (i32, i32, i32) {
    %c0_i32 = arith.constant 0 : i32
    %c0_i32_0 = arith.constant 0 : i32
    %c0_i32_1 = arith.constant 0 : i32
    return %arg0, %c0_i32, %c0_i32_0 : i32, i32, i32
  }
}

module attributes {stable_mosaic.version = 11 : i64} {
  func.func @_apply_kernel(%arg0: i32, %arg1: memref<16x64xbf16, #tpu.memory_space<vmem>>, %arg2: memref<64x256xbf16, #tpu.memory_space<vmem>>, %arg3: memref<1xf32, #tpu.memory_space<smem>>, %arg4: memref<1x256xf32, #tpu.memory_space<vmem>>, %arg5: memref<1x256xf32, #tpu.memory_space<vmem>>, %arg6: memref<16x256xf32, #tpu.memory_space<vmem>>) attributes {dimension_semantics = [#tpu.dimension_semantics<parallel>], iteration_bounds = array<i64: 2>, scalar_prefetch = 0 : i64, scratch_operands = 0 : i64, tpu.core_type = #tpu.core_type<tc>, window_params = [{transform_indices = @transform_0, window_bounds = array<i64: 16, 64>}, {pipeline_mode = #tpu.pipeline_mode<synchronous>, transform_indices = @transform_1, window_bounds = array<i64: 64, 256>}, {transform_indices = @transform_2, window_bounds = array<i64: 1>}, {pipeline_mode = #tpu.pipeline_mode<synchronous>, transform_indices = @transform_3, window_bounds = array<i64: 1, 256>}, {pipeline_mode = #tpu.pipeline_mode<synchronous>, transform_indices = @transform_4, window_bounds = array<i64: 1, 256>}, {transform_indices = @transform_5, window_bounds = array<i64: 16, 256>}]} {
    %c0 = arith.constant 0 : index
    %c0_0 = arith.constant 0 : index
    %0 = vector.load %arg1[%c0, %c0_0] : memref<16x64xbf16, #tpu.memory_space<vmem>>, vector<16x64xbf16>
    %c0_1 = arith.constant 0 : index
    %c0_2 = arith.constant 0 : index
    %1 = vector.load %arg2[%c0_1, %c0_2] : memref<64x256xbf16, #tpu.memory_space<vmem>>, vector<64x256xbf16>
    %cst = arith.constant dense<0.000000e+00> : vector<16x256xf32>
    %2 = tpu.matmul %0, %1, %cst {dimension_numbers = #tpu.dot_dimension_numbers<[1], [0], [0], [1], [0, 0, 1, 1], [], []>} : vector<16x64xbf16>, vector<64x256xbf16>, vector<16x256xf32> -> vector<16x256xf32>
    %c0_3 = arith.constant 0 : index
    %3 = memref.load %arg3[%c0_3] : memref<1xf32, #tpu.memory_space<smem>>
    %cst_4 = arith.constant 0.000000e+00 : f32
    %4 = vector.broadcast %cst_4 : f32 to vector<16x256xf32>
    %5 = arith.cmpf oge, %2, %4 : vector<16x256xf32>
    %6 = vector.broadcast %3 : f32 to vector<16x256xf32>
    %7 = arith.mulf %6, %2 : vector<16x256xf32>
    %8 = arith.select %5, %2, %7 : vector<16x256xi1>, vector<16x256xf32>
    %c0_5 = arith.constant 0 : index
    %c0_6 = arith.constant 0 : index
    %9 = vector.load %arg4[%c0_5, %c0_6] : memref<1x256xf32, #tpu.memory_space<vmem>>, vector<1x256xf32>
    %10 = vector.broadcast %9 : vector<1x256xf32> to vector<16x256xf32>
    %11 = arith.mulf %8, %10 : vector<16x256xf32>
    %c0_7 = arith.constant 0 : index
    %c0_8 = arith.constant 0 : index
    %12 = vector.load %arg5[%c0_7, %c0_8] : memref<1x256xf32, #tpu.memory_space<vmem>>, vector<1x256xf32>
    %13 = vector.broadcast %12 : vector<1x256xf32> to vector<16x256xf32>
    %14 = arith.addf %11, %13 : vector<16x256xf32>
    %c0_9 = arith.constant 0 : index
    %c0_10 = arith.constant 0 : index
    %15 = vector.load %arg6[%c0_9, %c0_10] : memref<16x256xf32, #tpu.memory_space<vmem>>, vector<16x256xf32>
    tpu.vector_store %arg6[%c0_9, %c0_10], %14 {strides = array<i32>} : memref<16x256xf32, #tpu.memory_space<vmem>>, vector<16x256xf32>,
    return
  }
  func.func @transform_0(%arg0: i32) -> (i32, i32) {
    %c0_i32 = arith.constant 0 : i32
    %c0_i32_0 = arith.constant 0 : i32
    return %arg0, %c0_i32 : i32, i32
  }
  func.func @transform_1(%arg0: i32) -> (i32, i32) {
    %c0_i32 = arith.constant 0 : i32
    %c0_i32_0 = arith.constant 0 : i32
    %c0_i32_1 = arith.constant 0 : i32
    return %c0_i32, %c0_i32_0 : i32, i32
  }
  func.func @transform_2(%arg0: i32) -> i32 {
    %c0_i32 = arith.constant 0 : i32
    %c0_i32_0 = arith.constant 0 : i32
    return %c0_i32 : i32
  }
  func.func @transform_3(%arg0: i32) -> (i32, i32) {
    %c0_i32 = arith.constant 0 : i32
    %c0_i32_0 = arith.constant 0 : i32
    %c0_i32_1 = arith.constant 0 : i32
    return %c0_i32, %c0_i32_0 : i32, i32
  }
  func.func @transform_4(%arg0: i32) -> (i32, i32) {
    %c0_i32 = arith.constant 0 : i32
    %c0_i32_0 = arith.constant 0 : i32
    %c0_i32_1 = arith.constant 0 : i32
    return %c0_i32, %c0_i32_0 : i32, i32
  }
  func.func @transform_5(%arg0: i32) -> (i32, i32) {
    %c0_i32 = arith.constant 0 : i32
    %c0_i32_0 = arith.constant 0 : i32
    return %arg0, %c0_i32 : i32, i32
  }
}

</mosaic_0001>

<bundles_post_ra>
// kernel: tile.13
= control target key start
LH: loop header
LB: loop body
LE: loop exit
PB: predicated region body
PF: predicated region fallthrough
CT: control target
= control target key end

     0   :  { %s64_s0 = inlined_call_operand.vmem [shape: f32[4], index: 0, kind: input, shape index: {}]   ;;  %s65_s1 = inlined_call_operand.vmem [shape: f32[64,4], index: 1, kind: output, shape index: {}]  }
   0x1   :  { %v4_v0 = vld [vmem:[%s64_s0] ss:$0 sm:$0xff] }
   0x2   :  { %5 = vst [vmem:[%s65_s1] sm:$0xff] %v4_v0 }
   0x3   :  { %20 = vst [vmem:[%s65_s1 + $0x8] sm:$0xff] %v4_v0 }
   0x4   :  { %21 = vst [vmem:[%s65_s1 + $0x10] sm:$0xff] %v4_v0 }
   0x5   :  { %22 = vst [vmem:[%s65_s1 + $0x18] sm:$0xff] %v4_v0 }
   0x6   :  { %23 = vst [vmem:[%s65_s1 + $0x20] sm:$0xff] %v4_v0 }
   0x7   :  { %24 = vst [vmem:[%s65_s1 + $0x28] sm:$0xff] %v4_v0 }
   0x8   :  { %25 = vst [vmem:[%s65_s1 + $0x30] sm:$0xff] %v4_v0 }
   0x9   :  { %26 = vst [vmem:[%s65_s1 + $0x38] sm:$0xff] %v4_v0 }

// kernel: tile.14
= control target key start
LH: loop header
LB: loop body
LE: loop exit
PB: predicated region body
PF: predicated region fallthrough
CT: control target
= control target key end

     0   :  { %vm5_vm0 = vcmask 1041409   ;;  %s426_s14 = smov 124   ;;  %s427_s15 = smov 116   ;;  %vm7_vm1 = vcmask 31744   ;;  %vm17_vm2 = vcmask 1048544   ;;  %vm27_vm3 = vcmask 1015744   ;;  %s697_s0 = inlined_call_operand.vmem [shape: f32[64,4], index: 0, kind: input, shape index: {}]   ;;  %s698_s1 = inlined_call_operand.vmem [shape: f32[1,256], index: 1, kind: output, shape index: {}]  }
   0x1   :  { %v332_v0 = vld [vmem:[%s697_s0 + $0x1f] sm:$0x1]   ;;  %v336_v3 = vld [vmem:[%s697_s0 + $0x1d] sm:$0x1]   ;;  %v334_v6 = vld [vmem:[%s697_s0 + $0x1e] sm:$0x1]  }
   0x2   :  { %v333_v1 = vld [vmem:[%s697_s0 + $0x3e] sm:$0x2]   ;;  %v337_v4 = vld [vmem:[%s697_s0 + $0x3c] sm:$0x2]   ;;  %v335_v7 = vld [vmem:[%s697_s0 + $0x3d] sm:$0x2]  }
   0x3   :  { %v14_v2 = vsel %vm5_vm0, %v333_v1, %v332_v0  ;;  %v34_v5 = vsel %vm5_vm0, %v337_v4, %v336_v3  ;;  %v338_v8 = vld [vmem:[%s697_s0 + $0x1c] sm:$0x1]   ;;  %v24_v10 = vsel %vm5_vm0, %v335_v7, %v334_v6  ;;  %v340_v11 = vld [vmem:[%s697_s0 + $0x1b] sm:$0x1]   ;;  %s428_s28 = smov 108   ;;  %s429_s29 = smov 120  }
   0x4   :  { %15 = vrot.lane.b32.xlu0 %v14_v2, %s426_s14  ;;  %35 = vrot.lane.b32.xlu1 %v34_v5, %s427_s15  ;;  %v339_v9 = vld [vmem:[%s697_s0 + $0x3b] sm:$0x2]   ;;  %v341_v12 = vld [vmem:[%s697_s0 + $0x3a] sm:$0x2]   ;;  %s430_s30 = smov 112   ;;  %s431_s14 = smov 104  }
   0x5   :  { %v44_v13 = vsel %vm5_vm0, %v339_v9, %v338_v8  ;;  %v54_v14 = vsel %vm5_vm0, %v341_v12, %v340_v11  ;;  %v342_v15 = vld [vmem:[%s697_s0 + $0x1a] sm:$0x1]   ;;  %v344_v17 = vld [vmem:[%s697_s0 + $0x19] sm:$0x1]   ;;  %v346_v19 = vld [vmem:[%s697_s0 + $0x18] sm:$0x1]  }
   0x6   :  { %55 = vrot.lane.b32.xlu2 %v54_v14, %s428_s28  ;;  %v343_v16 = vld [vmem:[%s697_s0 + $0x39] sm:$0x2]   ;;  %v345_v18 = vld [vmem:[%s697_s0 + $0x38] sm:$0x2]   ;;  %v347_v20 = vld [vmem:[%s697_s0 + $0x37] sm:$0x2]  }
   0x7   :  { %v64_v21 = vsel %vm5_vm0, %v343_v16, %v342_v15  ;;  %v74_v22 = vsel %vm5_vm0, %v345_v18, %v344_v17  ;;  %v84_v23 = vsel %vm5_vm0, %v347_v20, %v346_v19  ;;  %s432_s15 = smov 100   ;;  %s433_s16 = smov 96   ;;  %v348_v24 = vld [vmem:[%s697_s0 + $0x17] sm:$0x1]   ;;  %v350_v26 = vld [vmem:[%s697_s0 + $0x16] sm:$0x1]  }
   0x8   :  { %v349_v25 = vld [vmem:[%s697_s0 + $0x36] sm:$0x2]   ;;  %v351_v27 = vld [vmem:[%s697_s0 + $0x35] sm:$0x2]   ;;  %v352_v28 = vld [vmem:[%s697_s0 + $0x15] sm:$0x1]  }
   0x9   :  { %v353_v29 = vld [vmem:[%s697_s0 + $0x34] sm:$0x2]   ;;  %v94_v30 = vsel %vm5_vm0, %v349_v25, %v348_v24  ;;  %v104_v31 = vsel %vm5_vm0, %v351_v27, %v350_v26  ;;  %s436_s2 = smov 84   ;;  %v354_v33 = vld [vmem:[%s697_s0 + $0x14] sm:$0x1]   ;;  %s439_s17 = smov 72  }
   0xa   :  { %v114_v32 = vsel %vm5_vm0, %v353_v29, %v352_v28  ;;  %v355_v34 = vld [vmem:[%s697_s0 + $0x33] sm:$0x2]   ;;  %v356_v35 = vld [vmem:[%s697_s0 + $0x13] sm:$0x1]   ;;  %v358_v37 = vld [vmem:[%s697_s0 + $0x12] sm:$0x1]  }
   0xb   :  { %v357_v36 = vld [vmem:[%s697_s0 + $0x32] sm:$0x2]   ;;  %v359_v38 = vld [vmem:[%s697_s0 + $0x31] sm:$0x2]   ;;  %v124_v39 = vsel %vm5_vm0, %v355_v34, %v354_v33  ;;  %v360_v42 = vld [vmem:[%s697_s0 + $0x11] sm:$0x1]  }
   0xc   :  { %25 = vrot.lane.b32.xlu0 %v24_v10, %s429_s29  ;;  %45 = vrot.lane.b32.xlu1 %v44_v13, %s430_s30  ;;  %s434_s29 = smov 92   ;;  %s435_s30 = smov 88   ;;  %v134_v40 = vsel %vm5_vm0, %v357_v36, %v356_v35  ;;  %v144_v41 = vsel %vm5_vm0, %v359_v38, %v358_v37  ;;  %v361_v43 = vld [vmem:[%s697_s0 + $0x30] sm:$0x2]   ;;  %v362_v44 = vld [vmem:[%s697_s0 + $0x10] sm:$0x1]  }
   0xd   :  { %v363_v45 = vld [vmem:[%s697_s0 + $0x2f] sm:$0x2]   ;;  %v364_v46 = vld [vmem:[%s697_s0 + $0xf] sm:$0x1]   ;;  %v154_v48 = vsel %vm5_vm0, %v361_v43, %v360_v42  ;;  %s442_s3 = smov 60   ;;  %s445_s18 = smov 48  }
   0xe   :  { %65 = vrot.lane.b32.xlu2 %v64_v21, %s431_s14  ;;  %v365_v47 = vld [vmem:[%s697_s0 + $0x2e] sm:$0x2]   ;;  %v164_v49 = vsel %vm5_vm0, %v363_v45, %v362_v44  ;;  %v366_v51 = vld [vmem:[%s697_s0 + $0xe] sm:$0x1]   ;;  %v368_v53 = vld [vmem:[%s697_s0 + $0xd] sm:$0x1]  }
   0xf   :  { %v174_v50 = vsel %vm5_vm0, %v365_v47, %v364_v46  ;;  %v367_v52 = vld [vmem:[%s697_s0 + $0x2d] sm:$0x2]   ;;  %v369_v54 = vld [vmem:[%s697_s0 + $0x2c] sm:$0x2]   ;;  %v370_v55 = vld [vmem:[%s697_s0 + $0xc] sm:$0x1]  }
  0x10   :  { %v371_v56 = vld [vmem:[%s697_s0 + $0x2b] sm:$0x2]   ;;  %v184_v57 = vsel %vm5_vm0, %v367_v52, %v366_v51  ;;  %v194_v58 = vsel %vm5_vm0, %v369_v54, %v368_v53  ;;  %v372_v60 = vld [vmem:[%s697_s0 + $0xb] sm:$0x1]   ;;  %v374_v62 = vld [vmem:[%s697_s0 + $0xa] sm:$0x1]  }
  0x11   :  { %v204_v59 = vsel %vm5_vm0, %v371_v56, %v370_v55  ;;  %v373_v61 = vld [vmem:[%s697_s0 + $0x2a] sm:$0x2]   ;;  %v375_v63 = vld [vmem:[%s697_s0 + $0x29] sm:$0x2]   ;;  %v376_v0 = vld [vmem:[%s697_s0 + $0x9] sm:$0x1]  }
  0x12   :  { %v377_v1 = vld [vmem:[%s697_s0 + $0x28] sm:$0x2]   ;;  %v214_v2 = vsel %vm5_vm0, %v373_v61, %v372_v60  ;;  %v224_v3 = vsel %vm5_vm0, %v375_v63, %v374_v62  ;;  %s448_s4 = smov 36   ;;  %v378_v5 = vld [vmem:[%s697_s0 + $0x8] sm:$0x1]   ;;  %s451_s19 = smov 24  }
  0x13   :  { %v234_v4 = vsel %vm5_vm0, %v377_v1, %v376_v0  ;;  %v379_v6 = vld [vmem:[%s697_s0 + $0x27] sm:$0x2]   ;;  %v380_v7 = vld [vmem:[%s697_s0 + $0x7] sm:$0x1]   ;;  %v382_v9 = vld [vmem:[%s697_s0 + $0x6] sm:$0x1]  }
  0x14   :  { %75 = vrot.lane.b32.xlu0 %v74_v22, %s432_s15  ;;  %85 = vrot.lane.b32.xlu1 %v84_v23, %s433_s16  ;;  %s437_s15 = smov 80   ;;  %s438_s16 = smov 76   ;;  %v381_v8 = vld [vmem:[%s697_s0 + $0x26] sm:$0x2]   ;;  %v383_v10 = vld [vmem:[%s697_s0 + $0x25] sm:$0x2]   ;;  %v244_v11 = vsel %vm5_vm0, %v379_v6, %v378_v5 }
  0x15   :  { %v254_v12 = vsel %vm5_vm0, %v381_v8, %v380_v7  ;;  %v264_v13 = vsel %vm5_vm0, %v383_v10, %v382_v9  ;;  %v384_v14 = vld [vmem:[%s697_s0 + $0x5] sm:$0x1]   ;;  %v386_v16 = vld [vmem:[%s697_s0 + $0x4] sm:$0x1]   ;;  %v388_v18 = vld [vmem:[%s697_s0 + $0x3] sm:$0x1]  }
  0x16   :  { %95 = vrot.lane.b32.xlu2 %v94_v30, %s434_s29  ;;  %v385_v15 = vld [vmem:[%s697_s0 + $0x24] sm:$0x2]   ;;  %v387_v17 = vld [vmem:[%s697_s0 + $0x23] sm:$0x2]   ;;  %v389_v19 = vld [vmem:[%s697_s0 + $0x22] sm:$0x2]  }
  0x17   :  { %v274_v20 = vsel %vm5_vm0, %v385_v15, %v384_v14  ;;  %v284_v21 = vsel %vm5_vm0, %v387_v17, %v386_v16  ;;  %v294_v22 = vsel %vm5_vm0, %v389_v19, %v388_v18  ;;  %s454_s5 = smov 12   ;;  %v390_v23 = vld [vmem:[%s697_s0 + $0x2] sm:$0x1]   ;;  %v392_v25 = vld [vmem:[%s697_s0 + $0x1] sm:$0x1]   ;;  %s455_s14 = smov 8  }
  0x18   :  { %v391_v24 = vld [vmem:[%s697_s0 + $0x21] sm:$0x2]   ;;  %v393_v26 = vld [vmem:[%s697_s0 + $0x20] sm:$0x2]   ;;  %v2_v29 = vld [vmem:[%s697_s0] sm:$0x1]  }
  0x19   :  { %v304_v27 = vsel %vm5_vm0, %v391_v24, %v390_v23  ;;  %v314_v28 = vsel %vm5_vm0, %v393_v26, %v392_v25  ;;  %v331_v30 = vld [vmem:[%s697_s0 + $0x1f] sm:$0x2]   ;;  %vm37_vm4 = vcmask 982944   ;;  %vm47_vm5 = vcmask 950144  }
  0x1a   :  { %vm57_vm6 = vcmask 917344   ;;  %vm67_vm7 = vcmask 884544   ;;  %vm77_vm8 = vcmask 851744   ;;  %vm87_vm9 = vcmask 818944  }
  0x1b   :  { %vm97_vm10 = vcmask 786144   ;;  %vm107_vm11 = vcmask 753344   ;;  %vm117_vm12 = vcmask 720544   ;;  %vm127_vm13 = vcmask 687744  }
  0x1c   :  { %105 = vrot.lane.b32.xlu0 %v104_v31, %s435_s30  ;;  %115 = vrot.lane.b32.xlu1 %v114_v32, %s436_s2  ;;  %s440_s30 = smov 68   ;;  %s441_s2 = smov 64   ;;  %v6_v31 = vsel %vm5_vm0, %v331_v30, %v2_v29  ;;  %vm137_vm14 = vcmask 654944   ;;  %vm147_vm15 = vcmask 622144   ;;  %vm157_vm0 = vcmask 589344  }
  0x1d   :  { %8 = vst.msk [vmem:[#allocation0] ss:$8 sm:$0x3] %vm7_vm1, %v6_v31   ;;  %vm167_vm1 = vcmask 556544  }
  0x1e   :  { %125 = vrot.lane.b32.xlu2 %v124_v39, %s437_s15  ;;  %s456_s15 = smov 4  }
  0x24   :  { %135 = vrot.lane.b32.xlu0 %v134_v40, %s438_s16  ;;  %145 = vrot.lane.b32.xlu1 %v144_v41, %s439_s17  ;;  %s443_s16 = smov 56   ;;  %s444_s17 = smov 52  }
  0x26   :  { %155 = vrot.lane.b32.xlu2 %v154_v48, %s440_s30 }
  0x2c   :  { %165 = vrot.lane.b32.xlu0 %v164_v49, %s441_s2  ;;  %175 = vrot.lane.b32.xlu1 %v174_v50, %s442_s3  ;;  %s446_s2 = smov 44   ;;  %s447_s3 = smov 40  }
  0x2e   :  { %185 = vrot.lane.b32.xlu2 %v184_v57, %s443_s16 }
  0x34   :  { %195 = vrot.lane.b32.xlu0 %v194_v58, %s444_s17  ;;  %205 = vrot.lane.b32.xlu1 %v204_v59, %s445_s18  ;;  %s449_s17 = smov 32   ;;  %s450_s18 = smov 28  }
  0x36   :  { %215 = vrot.lane.b32.xlu2 %v214_v2, %s446_s2 }
  0x3c   :  { %225 = vrot.lane.b32.xlu0 %v224_v3, %s447_s3  ;;  %235 = vrot.lane.b32.xlu1 %v234_v4, %s448_s4  ;;  %s452_s3 = smov 20   ;;  %s453_s4 = smov 16  }
  0x3e   :  { %245 = vrot.lane.b32.xlu2 %v244_v11, %s449_s17 }
  0x44   :  { %255 = vrot.lane.b32.xlu0 %v254_v12, %s450_s18  ;;  %265 = vrot.lane.b32.xlu1 %v264_v13, %s451_s19 }
  0x46   :  { %275 = vrot.lane.b32.xlu2 %v274_v20, %s452_s3 }
  0x4c   :  { %285 = vrot.lane.b32.xlu0 %v284_v21, %s453_s4  ;;  %295 = vrot.lane.b32.xlu1 %v294_v22, %s454_s5 }
  0x4e   :  { %305 = vrot.lane.b32.xlu2 %v304_v27, %s455_s14 }
  0x54   :  { %315 = vrot.lane.b32.xlu0 %v314_v28, %s456_s15 }
  0x60   :  { %v56_v32 = vpop.permute.xlu2 %55  }
  0x68   :  { %v66_v33 = vpop.permute.xlu2 %65  }
  0x70   :  { %v96_v34 = vpop.permute.xlu2 %95  }
  0x76   :  { %v16_v35 = vpop.permute.xlu0 %15   ;;  %v36_v36 = vpop.permute.xlu1 %35  }
  0x77   :  { %18 = vst.msk [vmem:[#allocation0] ss:$8 sm:$0x3] %vm17_vm2, %v16_v35   ;;  %vm177_vm2 = vcmask 523744  }
  0x78   :  { %v126_v37 = vpop.permute.xlu2 %125  }
  0x7e   :  { %v26_v38 = vpop.permute.xlu0 %25   ;;  %v46_v39 = vpop.permute.xlu1 %45  }
  0x7f   :  { %28 = vst.msk [vmem:[#allocation0] ss:$8 sm:$0x3] %vm27_vm3, %v26_v38   ;;  %vm187_vm3 = vcmask 490944  }
  0x80   :  { %38 = vst.msk [vmem:[#allocation0] ss:$8 sm:$0x3] %vm37_vm4, %v36_v36   ;;  %v156_v40 = vpop.permute.xlu2 %155   ;;  %vm197_vm4 = vcmask 458144  }
  0x81   :  { %48 = vst.msk [vmem:[#allocation0] ss:$8 sm:$0x3] %vm47_vm5, %v46_v39   ;;  %vm207_vm5 = vcmask 425344  }
  0x82   :  { %58 = vst.msk [vmem:[#allocation0] ss:$8 sm:$0x3] %vm57_vm6, %v56_v32   ;;  %vm217_vm6 = vcmask 392544  }
  0x83   :  { %68 = vst.msk [vmem:[#allocation0] ss:$8 sm:$0x3] %vm67_vm7, %v66_v33   ;;  %vm227_vm7 = vcmask 359744  }
  0x86   :  { %v76_v41 = vpop.permute.xlu0 %75   ;;  %v86_v42 = vpop.permute.xlu1 %85  }
  0x87   :  { %78 = vst.msk [vmem:[#allocation0] ss:$8 sm:$0x3] %vm77_vm8, %v76_v41   ;;  %vm237_vm8 = vcmask 326944  }
  0x88   :  { %88 = vst.msk [vmem:[#allocation0] ss:$8 sm:$0x3] %vm87_vm9, %v86_v42   ;;  %v186_v43 = vpop.permute.xlu2 %185   ;;  %vm247_vm9 = vcmask 294144  }
  0x89   :  { %98 = vst.msk [vmem:[#allocation0] ss:$8 sm:$0x3] %vm97_vm10, %v96_v34   ;;  %vm257_vm10 = vcmask 261344  }
  0x8e   :  { %v106_v44 = vpop.permute.xlu0 %105   ;;  %v116_v45 = vpop.permute.xlu1 %115  }
  0x8f   :  { %108 = vst.msk [vmem:[#allocation0] ss:$8 sm:$0x3] %vm107_vm11, %v106_v44   ;;  %vm267_vm11 = vcmask 228544  }
  0x90   :  { %118 = vst.msk [vmem:[#allocation0] ss:$8 sm:$0x3] %vm117_vm12, %v116_v45   ;;  %v216_v46 = vpop.permute.xlu2 %215   ;;  %vm277_vm12 = vcmask 195744  }
  0x91   :  { %128 = vst.msk [vmem:[#allocation0] ss:$8 sm:$0x3] %vm127_vm13, %v126_v37   ;;  %vm287_vm13 = vcmask 162944  }
  0x96   :  { %v136_v47 = vpop.permute.xlu0 %135   ;;  %v146_v48 = vpop.permute.xlu1 %145  }
  0x97   :  { %138 = vst.msk [vmem:[#allocation0] ss:$8 sm:$0x3] %vm137_vm14, %v136_v47   ;;  %vm297_vm14 = vcmask 130144  }
  0x98   :  { %148 = vst.msk [vmem:[#allocation0] ss:$8 sm:$0x3] %vm147_vm15, %v146_v48   ;;  %v246_v49 = vpop.permute.xlu2 %245   ;;  %vm307_vm15 = vcmask 97344  }
  0x99   :  { %158 = vst.msk [vmem:[#allocation0] ss:$8 sm:$0x3] %vm157_vm0, %v156_v40   ;;  %vm317_vm0 = vcmask 64544  }
  0x9e   :  { %v166_v50 = vpop.permute.xlu0 %165   ;;  %v176_v51 = vpop.permute.xlu1 %175  }
  0x9f   :  { %168 = vst.msk [vmem:[#allocation0] ss:$8 sm:$0x3] %vm167_vm1, %v166_v50  }
  0xa0   :  { %178 = vst.msk [vmem:[#allocation0] ss:$8 sm:$0x3] %vm177_vm2, %v176_v51   ;;  %v276_v52 = vpop.permute.xlu2 %275  }
  0xa1   :  { %188 = vst.msk [vmem:[#allocation0] ss:$8 sm:$0x3] %vm187_vm3, %v186_v43  }
  0xa6   :  { %v196_v53 = vpop.permute.xlu0 %195   ;;  %v206_v54 = vpop.permute.xlu1 %205  }
  0xa7   :  { %198 = vst.msk [vmem:[#allocation0] ss:$8 sm:$0x3] %vm197_vm4, %v196_v53  }
  0xa8   :  { %208 = vst.msk [vmem:[#allocation0] ss:$8 sm:$0x3] %vm207_vm5, %v206_v54   ;;  %v306_v55 = vpop.permute.xlu2 %305  }
  0xa9   :  { %218 = vst.msk [vmem:[#allocation0] ss:$8 sm:$0x3] %vm217_vm6, %v216_v46  }
  0xae   :  { %v226_v56 = vpop.permute.xlu0 %225   ;;  %v236_v57 = vpop.permute.xlu1 %235  }
  0xaf   :  { %228 = vst.msk [vmem:[#allocation0] ss:$8 sm:$0x3] %vm227_vm7, %v226_v56  }
  0xb0   :  { %238 = vst.msk [vmem:[#allocation0] ss:$8 sm:$0x3] %vm237_vm8, %v236_v57  }
  0xb1   :  { %248 = vst.msk [vmem:[#allocation0] ss:$8 sm:$0x3] %vm247_vm9, %v246_v49  }
  0xb6   :  { %v256_v58 = vpop.permute.xlu0 %255   ;;  %v266_v59 = vpop.permute.xlu1 %265  }
  0xb7   :  { %258 = vst.msk [vmem:[#allocation0] ss:$8 sm:$0x3] %vm257_vm10, %v256_v58  }
  0xb8   :  { %268 = vst.msk [vmem:[#allocation0] ss:$8 sm:$0x3] %vm267_vm11, %v266_v59  }
  0xb9   :  { %278 = vst.msk [vmem:[#allocation0] ss:$8 sm:$0x3] %vm277_vm12, %v276_v52  }
  0xbe   :  { %v286_v60 = vpop.permute.xlu0 %285   ;;  %v296_v61 = vpop.permute.xlu1 %295  }
  0xbf   :  { %288 = vst.msk [vmem:[#allocation0] ss:$8 sm:$0x3] %vm287_vm13, %v286_v60  }
  0xc0   :  { %298 = vst.msk [vmem:[#allocation0] ss:$8 sm:$0x3] %vm297_vm14, %v296_v61  }
  0xc1   :  { %308 = vst.msk [vmem:[#allocation0] ss:$8 sm:$0x3] %vm307_vm15, %v306_v55  }
  0xc6   :  { %v316_v62 = vpop.permute.xlu0 %315  }
  0xc7   :  { %318 = vst.msk [vmem:[#allocation0] ss:$8 sm:$0x3] %vm317_vm0, %v316_v62  }
  0xce   :  { %v321_v63 = vld [vmem:[#allocation0] sm:$0x1]  ;;  %v326_v0 = vld [vmem:[#allocation0 + $0x8] sm:$0x1] }
  0xcf   :  { %324 = vst [vmem:[%s698_s1] sm:$0x1] %v321_v63 }
  0xd0   :  { %394 = vst [vmem:[%s698_s1 + $0x1] sm:$0x1] %v326_v0 }

// kernel: deconvolution_forward.2
= control target key start
LH: loop header
LB: loop body
LE: loop exit
PB: predicated region body
PF: predicated region fallthrough
CT: control target
= control target key end

     0   :  { %s471_s14 = smov 0   ;;  %s541_s0 = inlined_call_operand.vmem [shape: bf16[32,64], index: 0, kind: input, shape index: {}]   ;;  %s542_s1 = inlined_call_operand.vmem [shape: bf16[64,256], index: 1, kind: input, shape index: {}]   ;;  %s543_s2 = inlined_call_operand.<no memory space> [shape: f32[1], index: 2, kind: input, shape index: {}]   ;;  %s544_s3 = inlined_call_operand.vmem [shape: f32[2,2,256], index: 3, kind: output, shape index: {}]  }
   0x1   :  { %8 = sst [smem:[#allocation2]] %s543_s2 }
   0x2 LB: > { %s477_s15 = sadd.s32 4294967295, %s446_s14   ;;  %p377_p0 = scmp.ge.s32.totalorder %s446_s14, 1  ;;  %s446_s14 = sphi %s471_s14, %s14_s14  }
   0x3   : > { %p139_p1 = scmp.lt.s32.totalorder %s446_s14, 3 }
   0x5   : > { %p140_p2 = pnand %p377_p0, %p139_p1 }
   0x6   : > { %s378_s12 = sshll.u32 (!%p140_p2), %s477_s15, 1  ;;  %s262_s26 = sld [smem:[#allocation2]] (!%p140_p2) }
   0x7   : > { %143 = sbr.rel (%p140_p2) target bundleno = 189 (0xbd), region = 32  ;;  %p164_p3 = scmp.lt.s32.totalorder (!%p140_p2), %s378_s12, 3 }
   0x8   : > { %p169_p4 = scmp.lt.s32.totalorder (!%p140_p2), %s477_s15, 1 }
   0xc   : > { %v412_v0 = vld [vmem:[%s542_s1 + $0x30] sm:$0xf]  ;;  %v431_v1 = vld [vmem:[%s542_s1 + $0x34] sm:$0xf0]  ;;  %v430_v2 = vld [vmem:[%s542_s1 + $0x34] sm:$0xf]  ;;  %v267_v27 = vstv %s262_s26 }
   0xd   : > { %v413_v3 = vor.u32 %v431_v1, %v412_v0  ;;  %v414_v4 = vld [vmem:[%s542_s1 + $0x38] sm:$0xf0]  ;;  %v404_v5 = vld [vmem:[%s542_s1 + $0x20] sm:$0xf]  ;;  %v429_v6 = vld [vmem:[%s542_s1 + $0x24] sm:$0xf0] }
   0xe   : > { %v417_v7 = vor.u32 %v430_v2, %v414_v4  ;;  %v428_v8 = vld [vmem:[%s542_s1 + $0x24] sm:$0xf]  ;;  %v406_v9 = vld [vmem:[%s542_s1 + $0x28] sm:$0xf0]  ;;  %v405_v10 = vor.u32 %v429_v6, %v404_v5  ;;  %v396_v12 = vld [vmem:[%s542_s1 + $0x10] sm:$0xf] }
   0xf   : > { %238 = vmatpush.bf16.msra.mxu0 %v413_v3  ;;  %v409_v11 = vor.u32 %v428_v8, %v406_v9  ;;  %v427_v13 = vld [vmem:[%s542_s1 + $0x14] sm:$0xf0]  ;;  %v426_v14 = vld [vmem:[%s542_s1 + $0x14] sm:$0xf]  ;;  %v398_v15 = vld [vmem:[%s542_s1 + $0x18] sm:$0xf0] }
  0x10   : > { %252 = vmatpush.bf16.msra.mxu1 %v417_v7  ;;  %v397_v16 = vor.u32 %v427_v13, %v396_v12  ;;  %v401_v17 = vor.u32 %v426_v14, %v398_v15  ;;  %v388_v18 = vld [vmem:[%s542_s1] sm:$0xf]  ;;  %v425_v19 = vld [vmem:[%s542_s1 + $0x4] sm:$0xf0]  ;;  %s546_s12 = smov (!%p164_p3, %s378_s12), 3  ;;  %vm230_vm0 = vcmask 523264  }
  0x11   : > { %v424_v20 = vld [vmem:[%s542_s1 + $0x4] sm:$0xf]  ;;  %v390_v21 = vld [vmem:[%s542_s1 + $0x8] sm:$0xf0]  ;;  %s379_s22 = sshll.u32 %s546_s12, 2  ;;  %v389_v22 = vor.u32 %v425_v19, %v388_v18  ;;  %s548_s15 = smov (!%p169_p4, %s477_s15), 1 }
  0x12   : > { %s167_s25 = scalar_lea.vmem %s541_s0, %s379_s22  ;;  %v393_v23 = vor.u32 %v424_v20, %v390_v21  ;;  %vm308_vm5 = vcmask 1040384   ;;  %s422_s27 = sshll.u32 %s548_s15, 2  ;;  %vm314_vm6 = vcmask 1041408  }
  0x13   : > { %239 = vmatpush.bf16.msra.mxu0 %v405_v10  ;;  %v423_v24 = vld [vmem:[%s167_s25] sm:$0xff]  ;;  %s173_s30 = scalar_lea.vmem %s544_s3, %s422_s27 }
  0x14   : > { %253 = vmatpush.bf16.msra.mxu1 %v409_v11 }
  0x17   : > { %240 = vmatpush.bf16.msra.mxu0 %v397_v16 }
  0x18   : > { %254 = vmatpush.bf16.msra.mxu1 %v401_v17 }
  0x1b   : > { %241 = vmatpush.bf16.msra.mxu0 %v389_v22 }
  0x1c   : > { %255 = vmatpush.bf16.msra.mxu1 %v393_v23 }
  0x1e   : > { %418 = vmatmul.msk.bf16.vlgmr.msra.gmra.mxu0 %vm230_vm0, %v423_v24 }
  0x1f   : > { %419 = vmatmul.msk.bf16.vlgmr.msra.gmra.mxu1 %vm230_vm0, %v423_v24 }
  0x9b   : > { %v243_v25 = vpop.f32.mrf.mxu0 }
  0x9c   : > { %v257_v26 = vpop.f32.mrf.mxu1  ;;  %v268_v28 = vmul.f32 %v267_v27, %v243_v25  ;;  %vm263_vm1 = vcmp.ge.f32.partialorder %v243_v25, 0.0 }
  0x9d   : > { %v269_v29 = vmul.f32 %v267_v27, %v257_v26  ;;  %vm264_vm2 = vcmp.ge.f32.partialorder %v257_v26, 0.0 }
  0x9e   : > { %v272_v31 = vsel %vm263_vm1, %v243_v25, %v268_v28 }
  0x9f   : > { %v273_v34 = vsel %vm264_vm2, %v257_v26, %v269_v29  ;;  %v290_v37 = vmul.f32 %v272_v31, %v272_v31 }
  0xa0   : > { %v291_v41 = vmul.f32 %v273_v34, %v273_v34 }
  0xa3   : > { %v245_v30 = vpop.f32.mrf.mxu0 }
  0xa4   : > { %vm265_vm3 = vcmp.ge.f32.partialorder %v245_v30, 0.0  ;;  %v270_v32 = vmul.f32 %v267_v27, %v245_v30  ;;  %v259_v33 = vpop.f32.mrf.mxu1 }
  0xa5   : > { %vm266_vm4 = vcmp.ge.f32.partialorder %v259_v33, 0.0  ;;  %v271_v35 = vmul.f32 %v267_v27, %v259_v33 }
  0xa6   : > { %v274_v36 = vsel %vm265_vm3, %v245_v30, %v270_v32 }
  0xa7   : > { %v276_v38 = vadd.f32 %v274_v36, %v272_v31  ;;  %v292_v39 = vmul.f32 %v274_v36, %v274_v36  ;;  %v275_v40 = vsel %vm266_vm4, %v259_v33, %v271_v35 }
  0xa8   : > { %v283_v42 = vadd.f32 %v275_v40, %v273_v34  ;;  %v293_v43 = vmul.f32 %v275_v40, %v275_v40 }
  0xa9   : > { %v277_v44 = vrot.slane %v276_v38, 4  ;;  %v294_v45 = vadd.f32 %v292_v39, %v290_v37 }
  0xaa   : > { %v284_v46 = vrot.slane %v283_v42, 4  ;;  %v301_v47 = vadd.f32 %v293_v43, %v291_v41 }
  0xab   : > { %v278_v48 = vadd.f32 %v277_v44, %v276_v38  ;;  %v295_v49 = vrot.slane %v294_v45, 4 }
  0xac   : > { %v285_v50 = vadd.f32 %v284_v46, %v283_v42  ;;  %v302_v51 = vrot.slane %v301_v47, 4 }
  0xad   : > { %v279_v52 = vrot.slane %v278_v48, 2  ;;  %v296_v53 = vadd.f32 %v295_v49, %v294_v45 }
  0xae   : > { %v286_v54 = vrot.slane %v285_v50, 2  ;;  %v303_v55 = vadd.f32 %v302_v51, %v301_v47 }
  0xaf   : > { %v297_v56 = vrot.slane %v296_v53, 2  ;;  %v280_v57 = vadd.f32 %v279_v52, %v278_v48 }
  0xb0   : > { %v287_v58 = vadd.f32 %v286_v54, %v285_v50  ;;  %v304_v59 = vrot.slane %v303_v55, 2 }
  0xb1   : > { %v298_v60 = vadd.f32 %v297_v56, %v296_v53  ;;  %v281_v0 = vrot.slane %v280_v57, 1 }
  0xb2   : > { %v288_v61 = vrot.slane %v287_v58, 1  ;;  %v305_v62 = vadd.f32 %v304_v59, %v303_v55 }
  0xb3   : > { %v299_v63 = vrot.slane %v298_v60, 1  ;;  %v282_v5 = vadd.f32 %v281_v0, %v280_v57 }
  0xb4   : > { %v306_v1 = vrot.slane %v305_v62, 1  ;;  %v289_v3 = vadd.f32 %v288_v61, %v287_v58 }
  0xb5   : > { %v300_v2 = vadd.f32 %v299_v63, %v298_v60 }
  0xb6   : > { %v307_v4 = vadd.f32 %v306_v1, %v305_v62 }
  0xb7   : > { %v309_v8 = vsel %vm308_vm5, %v282_v5, %v300_v2 }
  0xb8   : > { %v310_v6 = vsel %vm308_vm5, %v289_v3, %v307_v4 }
  0xb9   : > { %v313_v7 = vrot.slane %v310_v6, 6 }
  0xbb   : > { %v315_v9 = vsel %vm314_vm6, %v309_v8, %v313_v7 }
  0xbc   : > { %317 = vst [vmem:[%s173_s30] sm:$0xf] %v315_v9 }
  0xbd PF: > { %s14_s14 = sadd.s32 1, %s446_s14  }
  0xbe   : > { %p11_p5 = scmp.ge.s32.totalorder %s14_s14, 4  }
  0xc0   :  { %13 = sbr.rel (!%p11_p5) target bundleno = 2 (0x2), region = 62 }

// kernel: deconvolution_forward.3
= control target key start
LH: loop header
LB: loop body
LE: loop exit
PB: predicated region body
PF: predicated region fallthrough
CT: control target
= control target key end

     0   :  { %s524_s20 = smov 0   ;;  %s599_s0 = inlined_call_operand.vmem [shape: bf16[32,64], index: 0, kind: input, shape index: {}]   ;;  %s600_s1 = inlined_call_operand.vmem [shape: bf16[64,256], index: 1, kind: input, shape index: {}]   ;;  %s601_s2 = inlined_call_operand.<no memory space> [shape: f32[1], index: 2, kind: input, shape index: {}]   ;;  %s602_s3 = inlined_call_operand.vmem [shape: f32[1,256], index: 3, kind: input, shape index: {}]   ;;  %s603_s4 = inlined_call_operand.vmem [shape: f32[1,256], index: 4, kind: input, shape index: {}]   ;;  %s604_s5 = inlined_call_operand.vmem [shape: f32[32,256], index: 5, kind: output, shape index: {}]  }
   0x1   :  { %10 = sst [smem:[#allocation2]] %s601_s2 }
   0x2 LB: > { %s415_s21 = sadd.s32 4294967295, %s489_s20   ;;  %p419_p0 = scmp.ge.s32.totalorder %s489_s20, 1  ;;  %s489_s20 = sphi %s524_s20, %s16_s20  }
   0x3   : > { %p189_p1 = scmp.lt.s32.totalorder %s489_s20, 3 }
   0x5   : > { %p190_p2 = pnand %p419_p0, %p189_p1 }
   0x6   : > { %s420_s22 = sshll.u32 (!%p190_p2), %s415_s21, 1  ;;  %s319_s8 = sld [smem:[#allocation2]] (!%p190_p2) }
   0x7   : > { %193 = sbr.rel (%p190_p2) target bundleno = 173 (0xad), region = 40  ;;  %p219_p3 = scmp.lt.s32.totalorder (!%p190_p2), %s420_s22, 3 }
   0xc   : > { %v455_v0 = vld [vmem:[%s600_s1 + $0x30] sm:$0xf]  ;;  %v474_v1 = vld [vmem:[%s600_s1 + $0x34] sm:$0xf0]  ;;  %v473_v2 = vld [vmem:[%s600_s1 + $0x34] sm:$0xf]  ;;  %v324_v26 = vstv %s319_s8 }
   0xd   : > { %v456_v3 = vor.u32 %v474_v1, %v455_v0  ;;  %v457_v4 = vld [vmem:[%s600_s1 + $0x38] sm:$0xf0]  ;;  %v447_v5 = vld [vmem:[%s600_s1 + $0x20] sm:$0xf]  ;;  %v472_v6 = vld [vmem:[%s600_s1 + $0x24] sm:$0xf0] }
   0xe   : > { %v460_v7 = vor.u32 %v473_v2, %v457_v4  ;;  %v471_v8 = vld [vmem:[%s600_s1 + $0x24] sm:$0xf]  ;;  %v449_v9 = vld [vmem:[%s600_s1 + $0x28] sm:$0xf0]  ;;  %v448_v10 = vor.u32 %v472_v6, %v447_v5  ;;  %v439_v12 = vld [vmem:[%s600_s1 + $0x10] sm:$0xf] }
   0xf   : > { %295 = vmatpush.bf16.msra.mxu0 %v456_v3  ;;  %v452_v11 = vor.u32 %v471_v8, %v449_v9  ;;  %v470_v13 = vld [vmem:[%s600_s1 + $0x14] sm:$0xf0]  ;;  %v469_v14 = vld [vmem:[%s600_s1 + $0x14] sm:$0xf]  ;;  %v441_v15 = vld [vmem:[%s600_s1 + $0x18] sm:$0xf0] }
  0x10   : > { %309 = vmatpush.bf16.msra.mxu1 %v460_v7  ;;  %v440_v16 = vor.u32 %v470_v13, %v439_v12  ;;  %v444_v17 = vor.u32 %v469_v14, %v441_v15  ;;  %v431_v18 = vld [vmem:[%s600_s1] sm:$0xf]  ;;  %v468_v19 = vld [vmem:[%s600_s1 + $0x4] sm:$0xf0]  ;;  %s606_s22 = smov (!%p219_p3, %s420_s22), 3  ;;  %vm287_vm0 = vcmask 523264  }
  0x11   : > { %v467_v20 = vld [vmem:[%s600_s1 + $0x4] sm:$0xf]  ;;  %v433_v21 = vld [vmem:[%s600_s1 + $0x8] sm:$0xf0]  ;;  %s421_s29 = sshll.u32 %s606_s22, 2  ;;  %v432_v22 = vor.u32 %v468_v19, %v431_v18  ;;  %s465_s13 = sshll.u32 %s606_s22, 4 }
  0x12   : > { %s222_s7 = scalar_lea.vmem %s599_s0, %s421_s29  ;;  %v436_v23 = vor.u32 %v467_v20, %v433_v21  ;;  %v333_v25 = vld [vmem:[%s602_s3] sm:$0x3]  ;;  %s229_s16 = scalar_lea.vmem %s604_s5, %s465_s13 }
  0x13   : > { %296 = vmatpush.bf16.msra.mxu0 %v448_v10  ;;  %v466_v24 = vld [vmem:[%s222_s7] sm:$0xff]  ;;  %v335_v29 = vperm.slane %v333_v25, 0  ;;  %v336_v32 = vperm.slane %v333_v25, 1 }
  0x14   : > { %310 = vmatpush.bf16.msra.mxu1 %v452_v11  ;;  %v343_v27 = vld [vmem:[%s603_s4] sm:$0x3] }
  0x15   : > { %v345_v33 = vperm.slane %v343_v27, 0  ;;  %v346_v36 = vperm.slane %v343_v27, 1 }
  0x17   : > { %297 = vmatpush.bf16.msra.mxu0 %v440_v16 }
  0x18   : > { %311 = vmatpush.bf16.msra.mxu1 %v444_v17 }
  0x1b   : > { %298 = vmatpush.bf16.msra.mxu0 %v432_v22 }
  0x1c   : > { %312 = vmatpush.bf16.msra.mxu1 %v436_v23 }
  0x1e   : > { %461 = vmatmul.msk.bf16.vlgmr.msra.gmra.mxu0 %vm287_vm0, %v466_v24 }
  0x1f   : > { %462 = vmatmul.msk.bf16.vlgmr.msra.gmra.mxu1 %vm287_vm0, %v466_v24 }
  0x9b   : > { %v300_v28 = vpop.f32.mrf.mxu0 }
  0x9c   : > { %vm320_vm1 = vcmp.ge.f32.partialorder %v300_v28, 0.0  ;;  %v325_v30 = vmul.f32 %v324_v26, %v300_v28  ;;  %v314_v31 = vpop.f32.mrf.mxu1 }
  0x9d   : > { %vm321_vm2 = vcmp.ge.f32.partialorder %v314_v31, 0.0  ;;  %v326_v34 = vmul.f32 %v324_v26, %v314_v31 }
  0x9e   : > { %v329_v35 = vsel %vm320_vm1, %v300_v28, %v325_v30 }
  0x9f   : > { %v339_v37 = vmul.f32 %v335_v29, %v329_v35  ;;  %v330_v38 = vsel %vm321_vm2, %v314_v31, %v326_v34 }
  0xa0   : > { %v340_v39 = vmul.f32 %v336_v32, %v330_v38 }
  0xa1   : > { %v349_v40 = vadd.f32 %v345_v33, %v339_v37 }
  0xa2   : > { %v350_v41 = vadd.f32 %v346_v36, %v340_v39 }
  0xa3   : > { %353 = vst [vmem:[%s229_s16] sm:$0xff] %v349_v40  ;;  %v302_v42 = vpop.f32.mrf.mxu0 }
  0xa4   : > { %354 = vst [vmem:[%s229_s16 + $0x8] sm:$0xff] %v350_v41  ;;  %vm322_vm3 = vcmp.ge.f32.partialorder %v302_v42, 0.0  ;;  %v327_v43 = vmul.f32 %v324_v26, %v302_v42  ;;  %v316_v44 = vpop.f32.mrf.mxu1 }
  0xa5   : > { %vm323_vm4 = vcmp.ge.f32.partialorder %v316_v44, 0.0  ;;  %v328_v45 = vmul.f32 %v324_v26, %v316_v44 }
  0xa6   : > { %v331_v46 = vsel %vm322_vm3, %v302_v42, %v327_v43 }
  0xa7   : > { %v341_v47 = vmul.f32 %v335_v29, %v331_v46  ;;  %v332_v48 = vsel %vm323_vm4, %v316_v44, %v328_v45 }
  0xa8   : > { %v342_v49 = vmul.f32 %v336_v32, %v332_v48 }
  0xa9   : > { %v351_v50 = vadd.f32 %v345_v33, %v341_v47 }
  0xaa   : > { %v352_v51 = vadd.f32 %v346_v36, %v342_v49 }
  0xab   : > { %355 = vst [vmem:[%s229_s16 + $0x10] sm:$0xff] %v351_v50 }
  0xac   : > { %356 = vst [vmem:[%s229_s16 + $0x18] sm:$0xff] %v352_v51 }
  0xad PF: > { %s16_s20 = sadd.s32 1, %s489_s20  }
  0xae   : > { %p13_p4 = scmp.ge.s32.totalorder %s16_s20, 4  }
  0xb0   :  { %15 = sbr.rel (!%p13_p4) target bundleno = 2 (0x2), region = 70 }

</bundles_post_ra>
